<compile_context>
chip_gen: v7x
topology: tpu7x:2x2x1
jax: 0.10.0
libtpu: 0.0.40
codegen_flags: <defaults>
</compile_context>

<pallas_src>
import jax
import jax.numpy as jnp
from jax.experimental import pallas as pl
from jax.experimental.pallas import tpu as pltpu


def _round_up(x, m):
    return ((x + m - 1) // m) * m


def mlp_kernel(x_ref, w1_ref, b1_ref, w2_ref, b2_ref, w3_ref, b3_ref, o_ref):
    in_f = x_ref.shape[0]
    out_f = o_ref.shape[0]

    x = x_ref[...]                                            # (in_f, TB), lane-dense batch

    # --- Layer 1: Linear(in -> H1) + ReLU ------------------------------------
    if in_f == 1:
        # K=1 contraction: skip the MXU, VPU broadcast outer product.
        h1 = w1_ref[...] * x                                  # (H1p,1)*(1,TB) -> (H1p,TB)
    else:
        h1 = jnp.dot(w1_ref[...], x, preferred_element_type=jnp.float32)
    h1 = jnp.maximum(h1 + b1_ref[...], 0.0)                   # f32 bias+ReLU
    # TODO(synk): Dropout(p=0.1) is identity in eval mode; training-mode mask not implemented.

    # --- Layer 2: Linear(H1 -> H2) + ReLU — bf16 MXU matmul, f32 accumulate --
    h2 = jnp.dot(w2_ref[...], h1.astype(w2_ref.dtype),
                 preferred_element_type=jnp.float32)           # (H2p, TB) f32
    h2 = jnp.maximum(h2 + b2_ref[...], 0.0)

    # --- Output layer: Linear(H2 -> out) -------------------------------------
    if out_f == 1:
        # N=1 output: elementwise multiply + sublane reduce (VPU + XLU), no MXU.
        out = jnp.sum(w3_ref[...] * h2, axis=0, keepdims=True)            # (1, TB)
    else:
        out = jnp.dot(w3_ref[...], h2.astype(w3_ref.dtype),
                      preferred_element_type=jnp.float32)                  # (out_f, TB)
    o_ref[...] = (out + b3_ref[...]).astype(o_ref.dtype)


def init_params(key, in_features=1, hidden_layers=(50, 30), out_features=1):
    """PyTorch nn.Linear-style params: W_i (out, in), b_i (out,), U(+-1/sqrt(fan_in))."""
    params = {}
    dims = [in_features, *hidden_layers, out_features]
    for idx, (fan_in, fan_out) in enumerate(zip(dims[:-1], dims[1:]), start=1):
        key, kw, kb = jax.random.split(key, 3)
        bound = 1.0 / (fan_in ** 0.5)
        params[f"w{idx}"] = jax.random.uniform(
            kw, (fan_out, fan_in), dtype=jnp.float32, minval=-bound, maxval=bound)
        params[f"b{idx}"] = jax.random.uniform(
            kb, (fan_out,), dtype=jnp.float32, minval=-bound, maxval=bound)
    return params


def prepare_params(params):
    """Zero-pad hidden dims to multiples of 8 and lay weights out for the kernel.

    Returns: w1 (H1p, in) f32, b1 (H1p, 1) f32, w2 (H2p, H1p) bf16, b2 (H2p, 1) f32,
             w3 (H2p, 1) f32 if out_f==1 else (out_f, H2p) bf16, b3 (out_f, 1) f32.
    Zero padding is numerically exact.
    """
    w1, b1 = params["w1"], params["b1"]     # (H1, in), (H1,)
    w2, b2 = params["w2"], params["b2"]     # (H2, H1), (H2,)
    w3, b3 = params["w3"], params["b3"]     # (out, H2), (out,)
    H1, H2 = w1.shape[0], w2.shape[0]
    out_f = w3.shape[0]
    H1p, H2p = _round_up(H1, 8), _round_up(H2, 8)      # sublane alignment only

    if out_f == 1:
        # Column layout for the VPU-multiply + sublane-reduce output path (f32).
        w3k = jnp.zeros((H2p, 1), jnp.float32).at[:H2, 0].set(w3[0])
    else:
        # Row layout for the bf16 MXU output matmul.
        w3k = jnp.zeros((out_f, H2p), jnp.bfloat16).at[:, :H2].set(
            w3.astype(jnp.bfloat16))

    kp = {
        "w1": jnp.zeros((H1p, w1.shape[1]), jnp.float32).at[:H1, :].set(w1),
        "b1": jnp.zeros((H1p, 1), jnp.float32).at[:H1, 0].set(b1),
        "w2": jnp.zeros((H2p, H1p), jnp.bfloat16).at[:H2, :H1].set(
            w2.astype(jnp.bfloat16)),
        "b2": jnp.zeros((H2p, 1), jnp.float32).at[:H2, 0].set(b2),
        "w3": w3k,
        "b3": b3.reshape(-1, 1).astype(jnp.float32),
    }
    return kp


def mlp_forward(x, kp, *, tb_max=4096):
    """x: (B, in_features) f32.  kp: output of prepare_params.  Returns (B, out_features)."""
    B, in_f = x.shape
    out_f = kp["b3"].shape[0]

    # Large lane-dense batch tiles; when the padded batch is >= 256, force at
    # least two grid steps so the "parallel" axis can shard across v7x's 2 TCs.
    B128 = _round_up(B, 128)
    if B128 >= 256:
        TB = min(tb_max, _round_up((B128 + 1) // 2, 128))
    else:
        TB = B128
    Bp = _round_up(B, TB)

    # Transpose in the wrapper so batch is on the lane axis inside the kernel
    # (padding via jnp.pad — no zeros+scatter buffer).
    x_t = jnp.pad(x.T.astype(jnp.float32), ((0, 0), (0, Bp - B)))

    const = lambda i: (0, 0)   # weights/biases: one block, resident across the grid
    out_t = pl.pallas_call(
        mlp_kernel,
        out_shape=jax.ShapeDtypeStruct((out_f, Bp), jnp.float32),
        grid=(Bp // TB,),
        in_specs=[
            pl.BlockSpec((in_f, TB), lambda i: (0, i)),   # x tile, pipelined over batch
            pl.BlockSpec(kp["w1"].shape, const),
            pl.BlockSpec(kp["b1"].shape, const),
            pl.BlockSpec(kp["w2"].shape, const),
            pl.BlockSpec(kp["b2"].shape, const),
            pl.BlockSpec(kp["w3"].shape, const),
            pl.BlockSpec(kp["b3"].shape, const),
        ],
        out_specs=pl.BlockSpec((out_f, TB), lambda i: (0, i)),
        compiler_params=pltpu.CompilerParams(
            dimension_semantics=("parallel",)),           # v7x: shard batch across TCs
    )(x_t, kp["w1"], kp["b1"], kp["w2"], kp["b2"], kp["w3"], kp["b3"])

    return out_t[:, :B].T


def mlp_reference(x, params):
    """Pure-JAX f32 reference (PyTorch layout, eval-mode dropout = identity)."""
    h = jnp.maximum(x @ params["w1"].T + params["b1"], 0.0)
    h = jnp.maximum(h @ params["w2"].T + params["b2"], 0.0)
    return h @ params["w3"].T + params["b3"]


def _run_case(key, in_features, hidden_layers, out_features, batch):
    k_params, k_x = jax.random.split(key)
    params = init_params(k_params, in_features, hidden_layers, out_features)
    kp = prepare_params(params)
    x = jax.random.normal(k_x, (batch, in_features), jnp.float32)

    out = jax.block_until_ready(mlp_forward(x, kp))
    ref = mlp_reference(x, params)

    assert out.shape == (batch, out_features), (out.shape, (batch, out_features))
    # Tolerance reflects bf16 MXU operands (f32 accumulation) on layers 2/3.
    assert jnp.allclose(out, ref, atol=1e-2, rtol=1e-2), \
        f"mismatch vs reference (max abs err {jnp.max(jnp.abs(out - ref))})"


if __name__ == "__main__":
    key = jax.random.PRNGKey(0)
    k0, k1 = jax.random.split(key)

    # Default module config: in=1, hidden=[50,30], out=1 (VPU-broadcast + sublane-reduce paths).
    _run_case(k0, in_features=1, hidden_layers=(50, 30), out_features=1, batch=8)

    # General config: exercises the MXU jnp.dot paths for layer 1 and the output layer.
    _run_case(k1, in_features=4, hidden_layers=(50, 30), out_features=3, batch=16)

    print("KERNEL_OK")
</pallas_src>

<mosaic_0001>
module attributes {stable_mosaic.version = 11 : i64} {
  func.func @mlp_kernel(%arg0: i32, %arg1: memref<1x128xf32, #tpu.memory_space<vmem>>, %arg2: memref<56x1xf32, #tpu.memory_space<vmem>>, %arg3: memref<56x1xf32, #tpu.memory_space<vmem>>, %arg4: memref<32x56xbf16, #tpu.memory_space<vmem>>, %arg5: memref<32x1xf32, #tpu.memory_space<vmem>>, %arg6: memref<32x1xf32, #tpu.memory_space<vmem>>, %arg7: memref<1x1xf32, #tpu.memory_space<vmem>>, %arg8: memref<1x128xf32, #tpu.memory_space<vmem>>) attributes {dimension_semantics = [#tpu.dimension_semantics<parallel>], iteration_bounds = array<i64: 1>, scalar_prefetch = 0 : i64, scratch_operands = 0 : i64, tpu.core_type = #tpu.core_type<tc>, window_params = [{transform_indices = @transform_0, window_bounds = array<i64: 1, 128>}, {pipeline_mode = #tpu.pipeline_mode<synchronous>, transform_indices = @transform_1, window_bounds = array<i64: 56, 1>}, {pipeline_mode = #tpu.pipeline_mode<synchronous>, transform_indices = @transform_2, window_bounds = array<i64: 56, 1>}, {pipeline_mode = #tpu.pipeline_mode<synchronous>, transform_indices = @transform_3, window_bounds = array<i64: 32, 56>}, {pipeline_mode = #tpu.pipeline_mode<synchronous>, transform_indices = @transform_4, window_bounds = array<i64: 32, 1>}, {pipeline_mode = #tpu.pipeline_mode<synchronous>, transform_indices = @transform_5, window_bounds = array<i64: 32, 1>}, {pipeline_mode = #tpu.pipeline_mode<synchronous>, transform_indices = @transform_6, window_bounds = array<i64: 1, 1>}, {transform_indices = @transform_7, window_bounds = array<i64: 1, 128>}]} {
    %c0 = arith.constant 0 : index
    %c0_0 = arith.constant 0 : index
    %0 = vector.load %arg1[%c0, %c0_0] : memref<1x128xf32, #tpu.memory_space<vmem>>, vector<1x128xf32>
    %c0_1 = arith.constant 0 : index
    %c0_2 = arith.constant 0 : index
    %1 = vector.load %arg2[%c0_1, %c0_2] : memref<56x1xf32, #tpu.memory_space<vmem>>, vector<56x1xf32>
    %2 = vector.broadcast %1 : vector<56x1xf32> to vector<56x128xf32>
    %3 = vector.broadcast %0 : vector<1x128xf32> to vector<56x128xf32>
    %4 = arith.mulf %2, %3 : vector<56x128xf32>
    %c0_3 = arith.constant 0 : index
    %c0_4 = arith.constant 0 : index
    %5 = vector.load %arg3[%c0_3, %c0_4] : memref<56x1xf32, #tpu.memory_space<vmem>>, vector<56x1xf32>
    %6 = vector.broadcast %5 : vector<56x1xf32> to vector<56x128xf32>
    %7 = arith.addf %4, %6 : vector<56x128xf32>
    %cst = arith.constant 0.000000e+00 : f32
    %8 = vector.broadcast %cst : f32 to vector<56x128xf32>
    %9 = arith.maximumf %7, %8 : vector<56x128xf32>
    %c0_5 = arith.constant 0 : index
    %c0_6 = arith.constant 0 : index
    %10 = vector.load %arg4[%c0_5, %c0_6] : memref<32x56xbf16, #tpu.memory_space<vmem>>, vector<32x56xbf16>
    %11 = arith.truncf %9 : vector<56x128xf32> to vector<56x128xbf16>
    %cst_7 = arith.constant dense<0.000000e+00> : vector<32x128xf32>
    %12 = tpu.matmul %10, %11, %cst_7 {dimension_numbers = #tpu.dot_dimension_numbers<[1], [0], [0], [1], [0, 0, 1, 1], [], []>} : vector<32x56xbf16>, vector<56x128xbf16>, vector<32x128xf32> -> vector<32x128xf32>
    %c0_8 = arith.constant 0 : index
    %c0_9 = arith.constant 0 : index
    %13 = vector.load %arg5[%c0_8, %c0_9] : memref<32x1xf32, #tpu.memory_space<vmem>>, vector<32x1xf32>
    %14 = vector.broadcast %13 : vector<32x1xf32> to vector<32x128xf32>
    %15 = arith.addf %12, %14 : vector<32x128xf32>
    %cst_10 = arith.constant 0.000000e+00 : f32
    %16 = vector.broadcast %cst_10 : f32 to vector<32x128xf32>
    %17 = arith.maximumf %15, %16 : vector<32x128xf32>
    %c0_11 = arith.constant 0 : index
    %c0_12 = arith.constant 0 : index
    %18 = vector.load %arg6[%c0_11, %c0_12] : memref<32x1xf32, #tpu.memory_space<vmem>>, vector<32x1xf32>
    %19 = vector.broadcast %18 : vector<32x1xf32> to vector<32x128xf32>
    %20 = arith.mulf %19, %17 : vector<32x128xf32>
    %cst_13 = arith.constant dense<0.000000e+00> : vector<128xf32>
    %21 = vector.multi_reduction <add>, %20, %cst_13 [0] : vector<32x128xf32> to vector<128xf32>
    %22 = vector.shape_cast %21 : vector<128xf32> to vector<1x128xf32>
    %c0_14 = arith.constant 0 : index
    %c0_15 = arith.constant 0 : index
    %23 = vector.load %arg7[%c0_14, %c0_15] : memref<1x1xf32, #tpu.memory_space<vmem>>, vector<1x1xf32>
    %24 = vector.broadcast %23 : vector<1x1xf32> to vector<1x128xf32>
    %25 = arith.addf %22, %24 : vector<1x128xf32>
    %c0_16 = arith.constant 0 : index
    %c0_17 = arith.constant 0 : index
    %26 = vector.load %arg8[%c0_16, %c0_17] : memref<1x128xf32, #tpu.memory_space<vmem>>, vector<1x128xf32>
    tpu.vector_store %arg8[%c0_16, %c0_17], %25 {strides = array<i32>} : memref<1x128xf32, #tpu.memory_space<vmem>>, vector<1x128xf32>,
    return
  }
  func.func @transform_0(%arg0: i32) -> (i32, i32) {
    %c0_i32 = arith.constant 0 : i32
    %c0_i32_0 = arith.constant 0 : i32
    return %c0_i32, %arg0 : i32, i32
  }
  func.func @transform_1(%arg0: i32) -> (i32, i32) {
    %c0_i32 = arith.constant 0 : i32
    %c0_i32_0 = arith.constant 0 : i32
    %c0_i32_1 = arith.constant 0 : i32
    return %c0_i32, %c0_i32_0 : i32, i32
  }
  func.func @transform_2(%arg0: i32) -> (i32, i32) {
    %c0_i32 = arith.constant 0 : i32
    %c0_i32_0 = arith.constant 0 : i32
    %c0_i32_1 = arith.constant 0 : i32
    return %c0_i32, %c0_i32_0 : i32, i32
  }
  func.func @transform_3(%arg0: i32) -> (i32, i32) {
    %c0_i32 = arith.constant 0 : i32
    %c0_i32_0 = arith.constant 0 : i32
    %c0_i32_1 = arith.constant 0 : i32
    return %c0_i32, %c0_i32_0 : i32, i32
  }
  func.func @transform_4(%arg0: i32) -> (i32, i32) {
    %c0_i32 = arith.constant 0 : i32
    %c0_i32_0 = arith.constant 0 : i32
    %c0_i32_1 = arith.constant 0 : i32
    return %c0_i32, %c0_i32_0 : i32, i32
  }
  func.func @transform_5(%arg0: i32) -> (i32, i32) {
    %c0_i32 = arith.constant 0 : i32
    %c0_i32_0 = arith.constant 0 : i32
    %c0_i32_1 = arith.constant 0 : i32
    return %c0_i32, %c0_i32_0 : i32, i32
  }
  func.func @transform_6(%arg0: i32) -> (i32, i32) {
    %c0_i32 = arith.constant 0 : i32
    %c0_i32_0 = arith.constant 0 : i32
    %c0_i32_1 = arith.constant 0 : i32
    return %c0_i32, %c0_i32_0 : i32, i32
  }
  func.func @transform_7(%arg0: i32) -> (i32, i32) {
    %c0_i32 = arith.constant 0 : i32
    %c0_i32_0 = arith.constant 0 : i32
    return %c0_i32, %arg0 : i32, i32
  }
}

</mosaic_0001>

<bundles_post_ra>
// kernel: tpu_custom_call.1
= control target key start
LH: loop header
LB: loop body
LE: loop exit
PB: predicated region body
PF: predicated region fallthrough
CT: control target
= control target key end

     0   :  { %s499_s0 = inlined_call_operand.vmem [shape: f32[1,128], index: 0, kind: input, shape index: {}]   ;;  %s500_s1 = inlined_call_operand.vmem [shape: f32[56,1], index: 1, kind: input, shape index: {}]   ;;  %s501_s2 = inlined_call_operand.vmem [shape: f32[56,1], index: 2, kind: input, shape index: {}]   ;;  %s502_s3 = inlined_call_operand.vmem [shape: bf16[32,56], index: 3, kind: input, shape index: {}]   ;;  %s503_s4 = inlined_call_operand.vmem [shape: f32[32,1], index: 4, kind: input, shape index: {}]   ;;  %s504_s5 = inlined_call_operand.vmem [shape: f32[32,1], index: 5, kind: input, shape index: {}]   ;;  %s505_s6 = inlined_call_operand.<no memory space> [shape: f32[1,1], index: 6, kind: input, shape index: {}]   ;;  %s506_s7 = inlined_call_operand.hbm [shape: f32[1,128], index: 7, kind: output, shape index: {}]  }
   0x1   :  { %v12_v0 = vstv %s505_s6 }
   0x2   :  { %13 = vst [vmem:[#allocation2] sm:$0x1] %v12_v0 }
   0x3   :  { %v86_v1 = vld [vmem:[%s501_s2] sm:$0xff]  ;;  %v365_v3 = vmov 0   ;;  %v87_v4 = vld [vmem:[%s501_s2 + $0x8] sm:$0xff]  ;;  %v34_v6 = vld [vmem:[%s500_s1 + $0x18] sm:$0xff] }
   0x4   :  { %v31_v2 = vld [vmem:[%s500_s1] sm:$0xff]  ;;  %338 = vset.pattern.permute.xlu1 %v365_v3  ;;  %337 = vset.pattern.permute.xlu0 %v365_v3  ;;  %v32_v5 = vld [vmem:[%s500_s1 + $0x8] sm:$0xff]  ;;  %v33_v7 = vld [vmem:[%s500_s1 + $0x10] sm:$0xff] }
   0x5   :  { %95 = vperm.xlu1 %338, %v86_v1   ;;  %40 = vperm.xlu0 %337, %v31_v2  }
   0x9   :  { %100 = vperm.xlu1 %338, %v87_v4   ;;  %45 = vperm.xlu0 %337, %v32_v5  }
   0xa   :  { %14 = vsyncpa [#allocation4], 0  ;;  %v89_v8 = vld [vmem:[%s501_s2 + $0x18] sm:$0xff]  ;;  %v88_v9 = vld [vmem:[%s501_s2 + $0x10] sm:$0xff]  ;;  %vm184_vm0 = vcmask 457728   ;;  %vm191_vm1 = vcmask 1043456  }
   0xb   :  { %v36_v10 = vld [vmem:[%s500_s1 + $0x28] sm:$0xff]  ;;  %v35_v11 = vld [vmem:[%s500_s1 + $0x20] sm:$0xff]  ;;  %v92_v14 = vld [vmem:[%s501_s2 + $0x30] sm:$0xff] }
   0xc   :  { %v91_v12 = vld [vmem:[%s501_s2 + $0x28] sm:$0xff]  ;;  %v90_v13 = vld [vmem:[%s501_s2 + $0x20] sm:$0xff]  ;;  %v37_v15 = vld [vmem:[%s500_s1 + $0x30] sm:$0xff] }
   0xd   :  { %55 = vperm.xlu1 %338, %v34_v6   ;;  %50 = vperm.xlu0 %337, %v33_v7   ;;  %v151_v16 = vld [vmem:[%s503_s4 + $0x8] sm:$0xff]  ;;  %v150_v17 = vld [vmem:[%s503_s4] sm:$0xff]  ;;  %v153_v18 = vld [vmem:[%s503_s4 + $0x18] sm:$0xff] }
   0xe   :  { %v152_v19 = vld [vmem:[%s503_s4 + $0x10] sm:$0xff]  ;;  %v249_v20 = vld [vmem:[%s504_s5 + $0x8] sm:$0xff]  ;;  %v248_v21 = vld [vmem:[%s504_s5] sm:$0xff] }
   0xf   :  { %v339_v22 = vld [vmem:[%s502_s3] sm:$0xff]   ;;  %v251_v23 = vld [vmem:[%s504_s5 + $0x18] sm:$0xff]  ;;  %v250_v24 = vld [vmem:[%s504_s5 + $0x10] sm:$0xff] }
  0x10   :  { %330 = vmatprep.mubr.msk.bf16.mxu0 %vm184_vm0, %v339_v22  ;;  %v285_v25 = vld [vmem:[#allocation2] sm:$0x1]  ;;  %v340_v3 = vld [vmem:[%s502_s3 + $0x8] sm:$0xff]   ;;  %s366_s3 = smov [#allocation3]  }
  0x11   :  { %110 = vperm.xlu1 %338, %v89_v8   ;;  %105 = vperm.xlu0 %337, %v88_v9   ;;  %v311_v26 = vld [vmem:[%s499_s0] ss:$0 sm:$0xff]  ;;  %s303_s23 = sshll.u32 %s366_s3, 4  ;;  %s304_s23 = int_to_ptr.vmem [resolvable:$true] %s303_s23 }
  0x12   :  { %s341_s24 = scalar_lea.vmem %s304_s23, 16  ;;  %s345_s25 = scalar_lea.vmem %s304_s23, 32 }
  0x13   :  { %p342_p0 = scmp.ne.s32.totalorder %s304_s23, %s341_s24  ;;  %p346_p1 = scmp.lt.s32.totalorder %s304_s23, %s304_s23 }
  0x14   :  { %p347_p2 = scmp.lt.s32.totalorder %s345_s25, %s341_s24 }
  0x15   :  { %65 = vperm.xlu1 %338, %v36_v10   ;;  %60 = vperm.xlu0 %337, %v35_v11  }
  0x16   :  { %p348_p3 = por %p347_p2, %p346_p1 }
  0x18   :  { %p349_p4 = pnand %p348_p3, %p342_p0 }
  0x19   :  { %120 = vperm.xlu1 %338, %v91_v12   ;;  %115 = vperm.xlu0 %337, %v90_v13  }
  0x1d   :  { %125 = vperm.xlu1 %338, %v92_v14   ;;  %70 = vperm.xlu0 %337, %v37_v15  }
  0x21   :  { %161 = vperm.xlu1 %338, %v151_v16   ;;  %156 = vperm.xlu0 %337, %v150_v17  }
  0x25   :  { %171 = vperm.xlu1 %338, %v153_v18   ;;  %166 = vperm.xlu0 %337, %v152_v19  }
  0x29   :  { %259 = vperm.xlu1 %338, %v249_v20   ;;  %254 = vperm.xlu0 %337, %v248_v21  }
  0x2d   :  { %269 = vperm.xlu1 %338, %v251_v23   ;;  %264 = vperm.xlu0 %337, %v250_v24  }
  0x31   :  { %288 = vperm.xlu0 %337, %v285_v25  }
  0x84   :  { %v96_v27 = vpop.permute.xlu1 %95  ;;  %v41_v28 = vpop.permute.xlu0 %40 }
  0x85   :  { %v79_v29 = vmul.f32 %v311_v26, %v41_v28 }
  0x87   :  { %v128_v32 = vadd.f32 %v96_v27, %v79_v29 }
  0x88   :  { %v101_v30 = vpop.permute.xlu1 %100  ;;  %v46_v31 = vpop.permute.xlu0 %45 }
  0x89   :  { %v80_v33 = vmul.f32 %v311_v26, %v46_v31  ;;  %v135_v37 = vmax.f32 %v128_v32, 0.0 }
  0x8b   :  { %v129_v34 = vadd.f32 %v101_v30, %v80_v33  ;;  %v291_v30 = vlaneseq }
  0x8c   :  { %v56_v35 = vpop.permute.xlu1 %55  ;;  %v51_v36 = vpop.permute.xlu0 %50 }
  0x8d   :  { %v136_v38 = vmax.f32 %v129_v34, 0.0  ;;  %v82_v39 = vmul.f32 %v311_v26, %v56_v35  ;;  %v81_v40 = vmul.f32 %v311_v26, %v51_v36  ;;  %v292_v33 = vshrl.u32 %v291_v30, 7 }
  0x8f   :  { %v146_v41 = vpack.c.bf16 %v136_v38, %v135_v37  ;;  %v293_v36 = vsub.s32 0, %v292_v33 }
  0x90   :  { %v111_v42 = vpop.permute.xlu1 %110  ;;  %v106_v43 = vpop.permute.xlu0 %105 }
  0x91   :  { %v131_v44 = vadd.f32 %v111_v42, %v82_v39  ;;  %v130_v45 = vadd.f32 %v106_v43, %v81_v40  ;;  %322 = vmatprep.subr.bf16.mxu0 %v146_v41 }
  0x92   :  { %323 = vmatpush3.bf16.msra.mxu0 %v146_v41 }
  0x93   :  { %v138_v46 = vmax.f32 %v131_v44, 0.0  ;;  %v137_v47 = vmax.f32 %v130_v45, 0.0 }
  0x94   :  { %v66_v48 = vpop.permute.xlu1 %65  ;;  %v61_v49 = vpop.permute.xlu0 %60 }
  0x95   :  { %v147_v50 = vpack.c.bf16 %v138_v46, %v137_v47  ;;  %v84_v51 = vmul.f32 %v311_v26, %v66_v48  ;;  %v83_v52 = vmul.f32 %v311_v26, %v61_v49 }
  0x97   :  { %324 = vmatprep.subr.bf16.mxu0 %v147_v50 }
  0x98   :  { %v121_v53 = vpop.permute.xlu1 %120  ;;  %v116_v54 = vpop.permute.xlu0 %115  ;;  %325 = vmatpush3.bf16.msra.mxu0 %v147_v50 }
  0x99   :  { %v133_v55 = vadd.f32 %v121_v53, %v84_v51  ;;  %v132_v56 = vadd.f32 %v116_v54, %v83_v52 }
  0x9b   :  { %v140_v57 = vmax.f32 %v133_v55, 0.0  ;;  %v139_v58 = vmax.f32 %v132_v56, 0.0 }
  0x9c   :  { %v71_v59 = vpop.permute.xlu0 %70  ;;  %v126_v62 = vpop.permute.xlu1 %125 }
  0x9d   :  { %v148_v60 = vpack.c.bf16 %v140_v57, %v139_v58  ;;  %v85_v61 = vmul.f32 %v311_v26, %v71_v59 }
  0x9f   :  { %v134_v63 = vadd.f32 %v126_v62, %v85_v61  ;;  %326 = vmatprep.subr.bf16.mxu0 %v148_v60 }
  0xa0   :  { %327 = vmatpush3.bf16.msra.mxu0 %v148_v60  ;;  %v157_v4 = vpop.permute.xlu0 %156  ;;  %v162_v5 = vpop.permute.xlu1 %161 }
  0xa1   :  { %v141_v0 = vmax.f32 %v134_v63, 0.0 }
  0xa3   :  { %v149_v1 = vpack.c.bf16 %v141_v0, %v141_v0 }
  0xa4   :  { %v167_v6 = vpop.permute.xlu0 %166  ;;  %v172_v7 = vpop.permute.xlu1 %171 }
  0xa5   :  { %334 = vmatprep.subr.msk.bf16.mxu0 %vm191_vm1, %v149_v1  ;;  %v193_v2 = vsel %vm191_vm1, %v149_v1, 0 }
  0xa6   :  { %329 = vmatpush3.bf16.msra.mxu0 %v193_v2 }
  0xa8   :  { %v255_v13 = vpop.permute.xlu0 %254  ;;  %v260_v18 = vpop.permute.xlu1 %259 }
  0xa9   :  { %331 = vmatmul.mubr.msk.bf16.vlgmr.msra.gmra.mrb[0].mxu0 %vm184_vm0, %v340_v3 }
  0xac   :  { %v265_v24 = vpop.permute.xlu0 %264  ;;  %v270_v27 = vpop.permute.xlu1 %269 }
  0xb0   :  { %v289_v38 = vpop.permute.xlu0 %288 }
  0xb1   :  { %v294_v40 = vrot.slane %v289_v38, %v293_v36 }
 0x17c   :  { %v332_v8 = vpop.f32.mrb[0].mxu0 }
 0x17d   :  { %v229_v9 = vpop.f32.mrb[1].mxu0  ;;  %v238_v10 = vadd.f32 %v332_v8, %v167_v6 }
 0x17e   :  { %v230_v11 = vadd.f32 %v229_v9, %v157_v4  ;;  %v333_v12 = vpop.f32.mrb[2].mxu0 }
 0x17f   :  { %v232_v14 = vpop.f32.mrb[3].mxu0  ;;  %v241_v16 = vadd.f32 %v333_v12, %v172_v7  ;;  %v246_v19 = vmax.f32 %v238_v10, 0.0 }
 0x180   :  { %v244_v15 = vmax.f32 %v230_v11, 0.0  ;;  %v233_v17 = vadd.f32 %v232_v14, %v162_v5 }
 0x181   :  { %v247_v22 = vmax.f32 %v241_v16, 0.0  ;;  %v274_v25 = vmul.f32 %v265_v24, %v246_v19 }
 0x182   :  { %v245_v20 = vmax.f32 %v233_v17, 0.0  ;;  %v272_v21 = vmul.f32 %v255_v13, %v244_v15 }
 0x183   :  { %v275_v28 = vmul.f32 %v270_v27, %v247_v22 }
 0x184   :  { %v273_v23 = vmul.f32 %v260_v18, %v245_v20 }
 0x186   :  { %v276_v26 = vadd.f32 %v273_v23, %v272_v21 }
 0x188   :  { %v277_v29 = vadd.f32 %v276_v26, %v274_v25 }
 0x18a   :  { %v278_v31 = vadd.f32 %v277_v29, %v275_v28 }
 0x18c   :  { %v279_v32 = vrot.slane %v278_v31, 4 }
 0x18e   :  { %v280_v34 = vadd.f32 %v279_v32, %v278_v31 }
 0x190   :  { %v281_v35 = vrot.slane %v280_v34, 2 }
 0x192   :  { %v282_v37 = vadd.f32 %v281_v35, %v280_v34 }
 0x194   :  { %v283_v39 = vrot.slane %v282_v37, 1 }
 0x196   :  { %v284_v41 = vadd.f32 %v283_v39, %v282_v37 }
 0x198   :  { %v295_v42 = vadd.f32 %v294_v40, %v284_v41 }
 0x19a   :  { %296 = vst [vmem:[#allocation3] sm:$0x1] %v295_v42 }
 0x19b   :  { %352 = shalt.err (!%p349_p4)
}
 0x19c   :  { %s353_s28 = scalar_lea.hbm %s506_s7, 16 }
 0x19d   :  { %p354_p5 = scmp.ne.s32.totalorder %s506_s7, %s353_s28  ;;  %p357_p6 = scmp.lt.u32.totalorder %s353_s28, %s506_s7 }
 0x19f   :  { %p359_p7 = pnand %p357_p6, %p354_p5 }
 0x1a1   :  { %362 = shalt.err (!%p359_p7)
}
 0x1a2   :  { %306 = dma.vmem_to_hbm [thread:$0]  %s304_s23, 16, %s506_s7, [#allocation4]  }
 0x1a3   :  { %363 = dma.done.wait [#allocation4], 16  }
 0x1a4   :  { %364 = vsyncadd [#allocation4], 4294967280 }
 0x1a5   :  { %310 = vsyncpa [#allocation4], 1 }

</bundles_post_ra>
